<compile_context>
chip_gen: v6e
topology: v6e:2x2x1
jax: 0.10.0
libtpu: 0.0.40
codegen_flags: <defaults>
</compile_context>

<pallas_src>
import functools

import numpy as np

import jax
import jax.numpy as jnp
from jax.experimental import pallas as pl
from jax.experimental.pallas import tpu as pltpu


def _cell_compute(x, halo_tail, skip, w2, wsr, b2, bsr, out_h_ref, out_skip_ref,
                  *, C, K, dilation, padding, tT):
    """Shared gated-conv + 1x1-conv body for one (C, tT) time tile.

    x         : (C, tT)       current h tile (storage dtype), time on lanes
    halo_tail : (C, padding)  causal left context (previous tile tail / zeros)
    skip      : (C, tT)       current skip tile
    w2        : (2C, K*C)     fused dilated-conv weights (f half stacked over g)
    wsr       : (2C, C)       fused 1x1-conv weights (residual over skip)
    b2, bsr   : (2C, 1)       f32 biases (broadcast over time)
    """
    # im2col: K causally shifted views stacked on sublanes -> a single MXU
    # contraction covering BOTH gate halves.  Shifts are built in vregs (lane
    # shifts on the XLU); no full-tile VMEM round trip.
    if K == 1:
        xim = x
    else:
        taps = []
        for j in range(K):                       # K is static -> unrolled
            s = padding - j * dilation           # causal shift of tap j
            if s == 0:
                taps.append(x)
            else:
                taps.append(jnp.concatenate(
                    [halo_tail[:, padding - s:], x[:, :tT - s]], axis=-1))
        xim = jnp.concatenate(taps, axis=0)      # (K*C, tT)

    # Fused gate matmul; split f/g on the sublane axis of the f32 result.
    y = jnp.dot(w2, xim, preferred_element_type=jnp.float32) + b2      # (2C, tT)
    z = jnp.tanh(y[:C]) * jax.nn.sigmoid(y[C:])                        # (C, tT) f32

    # Fused 1x1 conv; split residual/skip on sublanes.
    w = jnp.dot(wsr, z.astype(wsr.dtype), preferred_element_type=jnp.float32) + bsr

    out_h_ref[0, :, :] = (x.astype(jnp.float32) + w[:C]).astype(out_h_ref.dtype)
    out_skip_ref[0, :, :] = (skip.astype(jnp.float32) + w[C:]).astype(out_skip_ref.dtype)


def _kernel_carry(h_ref, skip_ref, w2_ref, wsr_ref, b2_ref, bsr_ref,
                  out_h_ref, out_skip_ref, halo_ref,
                  *, C, K, dilation, padding, tT, halo_cols):
    """Sequential time axis: causal halo carried across tiles in VMEM scratch."""
    ti = pl.program_id(1)
    x = h_ref[0, :, :]                                          # (C, tT)

    if padding > 0:
        @pl.when(ti == 0)
        def _():                                                # new sequence
            halo_ref[...] = jnp.zeros_like(halo_ref)
        halo_tail = halo_ref[:, halo_cols - padding:].astype(x.dtype)
    else:
        halo_tail = None

    _cell_compute(x, halo_tail, skip_ref[0, :, :], w2_ref[...], wsr_ref[...],
                  b2_ref[...], bsr_ref[...], out_h_ref, out_skip_ref,
                  C=C, K=K, dilation=dilation, padding=padding, tT=tT)

    if padding > 0:
        # Carry this tile's tail as the next tile's causal halo.
        halo_ref[:, halo_cols - padding:] = (
            x[:, tT - padding:].astype(halo_ref.dtype))


def _kernel_parallel(h_ref, hprev_ref, skip_ref, w2_ref, wsr_ref, b2_ref, bsr_ref,
                     out_h_ref, out_skip_ref,
                     *, C, K, dilation, padding, tT):
    """Both grid axes parallel (v7x megacore): halo read from prev tile's block."""
    ti = pl.program_id(1)
    x = h_ref[0, :, :]

    if padding > 0:
        prev_tail = hprev_ref[0, :, tT - padding:]              # prev tile tail
        halo_tail = jnp.where(ti > 0, prev_tail,
                              jnp.zeros_like(prev_tail)).astype(x.dtype)
    else:
        halo_tail = None

    _cell_compute(x, halo_tail, skip_ref[0, :, :], w2_ref[...], wsr_ref[...],
                  b2_ref[...], bsr_ref[...], out_h_ref, out_skip_ref,
                  C=C, K=K, dilation=dilation, padding=padding, tT=tT)


def _pick_time_tile(T, padding, max_tile=8192):
    """Largest time tile (128-multiple when possible) dividing T and >= padding."""
    if T <= max_tile:
        return T
    for cand in range(max_tile, 127, -128):
        if T % cand == 0 and cand >= padding:
            return cand
    return T


def wavenet_cell_forward(h_prev, skip_prev, w_dil, b_dil, w_sr, b_sr,
                         *, kernel_size, padding, dilation,
                         time_tile=None, compute_dtype=None, parallel_time=False):
    """h_prev, skip_prev: (B, C, T) (PyTorch NCL layout).  Returns same layout.

    compute_dtype : activation/weight storage + MXU input dtype (e.g. bf16);
                    accumulation, gating and biases stay f32.  None -> input dtype.
    parallel_time : read the causal halo from the previous tile's HBM block so
                    both grid axes are "parallel" (v7x, small B).  Default keeps
                    the cheaper sequential VMEM halo carry (v5e/v6e, 1 TC).
    """
    B, Cin, T = h_prev.shape
    C2 = w_dil.shape[0]
    C = C2 // 2
    K = kernel_size
    assert Cin == C, "residual add requires in_channels == out_channels"
    assert padding == dilation * (K - 1), "causal conv needs padding == dilation*(K-1)"

    dtype = np.dtype(compute_dtype) if compute_dtype is not None else h_prev.dtype

    tT = _pick_time_tile(T, padding) if time_tile is None else time_tile
    assert T % tT == 0, "time tile must divide T"
    assert padding <= tT, "halo must fit in one previous tile (raise time_tile)"
    nT = T // tT
    halo_cols = pl.cdiv(max(padding, 1), 128) * 128        # lane-aligned scratch width

    # --- tiny one-off weight/bias reshapes (no activation transposes / pads) ---
    w2 = jnp.transpose(w_dil, (0, 2, 1)).reshape(C2, K * Cin).astype(dtype)  # (2C, K*C)
    wsr = w_sr[:, :, 0].astype(dtype)                                        # (2C, C)
    b2 = b_dil.reshape(C2, 1).astype(jnp.float32)
    bsr = b_sr.reshape(C2, 1).astype(jnp.float32)
    h_in = h_prev.astype(dtype)
    skip_in = skip_prev.astype(dtype)

    act_spec = pl.BlockSpec((1, C, tT), lambda b, i: (b, 0, i))
    w2_spec = pl.BlockSpec((C2, K * Cin), lambda b, i: (0, 0))
    wsr_spec = pl.BlockSpec((C2, C), lambda b, i: (0, 0))
    bias_spec = pl.BlockSpec((C2, 1), lambda b, i: (0, 0))

    common = dict(C=C, K=K, dilation=dilation, padding=padding, tT=tT)
    if parallel_time:
        kernel = functools.partial(_kernel_parallel, **common)
        prev_spec = pl.BlockSpec((1, C, tT),
                                 lambda b, i: (b, 0, jnp.maximum(i - 1, 0)))
        in_specs = [act_spec, prev_spec, act_spec,
                    w2_spec, wsr_spec, bias_spec, bias_spec]
        operands = (h_in, h_in, skip_in, w2, wsr, b2, bsr)
        scratch_shapes = []
        dim_semantics = ("parallel", "parallel")
        # Only skip may be donated: out_h must NOT alias h, since tile i+1
        # re-reads tile i's h block as its halo source.
        io_aliases = {2: 1}
        n_streams = 5
    else:
        kernel = functools.partial(_kernel_carry, halo_cols=halo_cols, **common)
        in_specs = [act_spec, act_spec,
                    w2_spec, wsr_spec, bias_spec, bias_spec]
        operands = (h_in, skip_in, w2, wsr, b2, bsr)
        scratch_shapes = [pltpu.VMEM((C, halo_cols), jnp.float32)]
        dim_semantics = ("parallel", "arbitrary")   # halo carried across time tiles
        io_aliases = {0: 0, 1: 1}
        n_streams = 4

    # VMEM budget: double-buffered activation streams + weights + halo scratch
    # + headroom for f32 intermediates (im2col / gates / 1x1 result).
    act_bytes = C * tT * dtype.itemsize
    w_bytes = (C2 * K * Cin + C2 * C) * dtype.itemsize + 2 * C2 * 4
    inter_bytes = (K + 6) * C * tT * 4
    needed = 2 * n_streams * act_bytes + 2 * w_bytes + C * halo_cols * 4 + inter_bytes
    vmem_limit = int(min(64 * 2 ** 20, max(32 * 2 ** 20, 4 * needed)))

    out_h, out_skip = pl.pallas_call(
        kernel,
        out_shape=(jax.ShapeDtypeStruct((B, C, T), dtype),
                   jax.ShapeDtypeStruct((B, C, T), dtype)),
        grid=(B, nT),
        in_specs=in_specs,
        out_specs=(act_spec, act_spec),
        scratch_shapes=scratch_shapes,
        input_output_aliases=io_aliases,
        compiler_params=pltpu.CompilerParams(
            dimension_semantics=dim_semantics,
            vmem_limit_bytes=vmem_limit),
    )(*operands)

    return out_h, out_skip


def _reference_forward(h_prev, skip_prev, w_dil, b_dil, w_sr, b_sr,
                       *, padding, dilation):
    """Pure-JAX reference matching the PyTorch module (NCL layout)."""
    C = w_dil.shape[0] // 2
    xp = jnp.pad(h_prev, ((0, 0), (0, 0), (padding, 0)))
    y = jax.lax.conv_general_dilated(
        xp, w_dil, window_strides=(1,), padding="VALID",
        rhs_dilation=(dilation,), dimension_numbers=("NCH", "OIH", "NCH"),
    ) + b_dil[None, :, None]
    f, g = y[:, :C], y[:, C:]
    z = jnp.tanh(f) * jax.nn.sigmoid(g)
    w = jax.lax.conv_general_dilated(
        z, w_sr, window_strides=(1,), padding="VALID",
        dimension_numbers=("NCH", "OIH", "NCH"),
    ) + b_sr[None, :, None]
    return h_prev + w[:, :C], skip_prev + w[:, C:]


def _make_params(key, C, K):
    """Deterministic init mirroring the PyTorch __init__ shapes/scales."""
    k_wd, k_bd, k_ws, k_bs = jax.random.split(key, 4)
    k1 = (1.0 / (C * K)) ** 0.5
    w_dil = jax.random.uniform(k_wd, (2 * C, C, K), jnp.float32, -k1, k1)
    b_dil = jax.random.uniform(k_bd, (2 * C,), jnp.float32, -k1, k1)
    k2 = (1.0 / C) ** 0.5
    w_sr = jax.random.uniform(k_ws, (2 * C, C, 1), jnp.float32, -k2, k2)
    b_sr = jax.random.uniform(k_bs, (2 * C,), jnp.float32, -k2, k2)
    return w_dil, b_dil, w_sr, b_sr


if __name__ == "__main__":
    k_h1, k_s1, k_p1, k_h2, k_s2, k_p2 = jax.random.split(jax.random.PRNGKey(0), 6)

    # --- config 1: small channels, several time tiles (exercises halo carry) ---
    B, C, T, K, dil = 2, 8, 512, 2, 2
    pad = dil * (K - 1)
    h_prev = jax.random.normal(k_h1, (B, C, T), jnp.float32)
    skip_prev = jax.random.normal(k_s1, (B, C, T), jnp.float32)
    w_dil, b_dil, w_sr, b_sr = _make_params(k_p1, C, K)

    ref_h, ref_s = _reference_forward(h_prev, skip_prev, w_dil, b_dil, w_sr, b_sr,
                                      padding=pad, dilation=dil)
    args = (h_prev, skip_prev, w_dil, b_dil, w_sr, b_sr)
    kw = dict(kernel_size=K, padding=pad, dilation=dil, time_tile=128)

    # f32, sequential halo carry (v5e/v6e default).
    out_h, out_s = wavenet_cell_forward(*args, **kw)
    jax.block_until_ready((out_h, out_s))
    assert jnp.allclose(out_h, ref_h, atol=1e-4, rtol=1e-4)
    assert jnp.allclose(out_s, ref_s, atol=1e-4, rtol=1e-4)

    # f32, fully parallel grid (v7x megacore path).
    out_h, out_s = wavenet_cell_forward(*args, **kw, parallel_time=True)
    jax.block_until_ready((out_h, out_s))
    assert jnp.allclose(out_h, ref_h, atol=1e-4, rtol=1e-4)
    assert jnp.allclose(out_s, ref_s, atol=1e-4, rtol=1e-4)

    # bf16 activation/weight storage (halves HBM traffic); f32 accumulation.
    out_h, out_s = wavenet_cell_forward(*args, **kw, compute_dtype=jnp.bfloat16)
    jax.block_until_ready((out_h, out_s))
    assert jnp.allclose(out_h.astype(jnp.float32), ref_h, atol=5e-2, rtol=5e-2)
    assert jnp.allclose(out_s.astype(jnp.float32), ref_s, atol=5e-2, rtol=5e-2)

    # --- config 2: deep-layer geometry with padding > 128 (generalized halo) ---
    B, C, T, K, dil = 1, 16, 1024, 3, 96
    pad = dil * (K - 1)                      # 192 > 128
    h_prev = jax.random.normal(k_h2, (B, C, T), jnp.float32)
    skip_prev = jax.random.normal(k_s2, (B, C, T), jnp.float32)
    w_dil, b_dil, w_sr, b_sr = _make_params(k_p2, C, K)

    ref_h, ref_s = _reference_forward(h_prev, skip_prev, w_dil, b_dil, w_sr, b_sr,
                                      padding=pad, dilation=dil)
    out_h, out_s = wavenet_cell_forward(h_prev, skip_prev, w_dil, b_dil, w_sr, b_sr,
                                        kernel_size=K, padding=pad, dilation=dil,
                                        time_tile=512)
    jax.block_until_ready((out_h, out_s))
    assert jnp.allclose(out_h, ref_h, atol=1e-3, rtol=1e-3)
    assert jnp.allclose(out_s, ref_s, atol=1e-3, rtol=1e-3)

    print("KERNEL_OK")
</pallas_src>

<mosaic_0001>
module attributes {stable_mosaic.version = 11 : i64} {
  func.func @_kernel_carry(%arg0: i32, %arg1: i32, %arg2: memref<1x8x128xf32, #tpu.memory_space<vmem>>, %arg3: memref<1x8x128xf32, #tpu.memory_space<vmem>>, %arg4: memref<16x16xf32, #tpu.memory_space<vmem>>, %arg5: memref<16x8xf32, #tpu.memory_space<vmem>>, %arg6: memref<16x1xf32, #tpu.memory_space<vmem>>, %arg7: memref<16x1xf32, #tpu.memory_space<vmem>>, %arg8: memref<1x8x128xf32, #tpu.memory_space<vmem>>, %arg9: memref<1x8x128xf32, #tpu.memory_space<vmem>>, %arg10: memref<8x128xf32, #tpu.memory_space<vmem>>) attributes {dimension_semantics = [#tpu.dimension_semantics<parallel>, #tpu.dimension_semantics<arbitrary>], iteration_bounds = array<i64: 2, 4>, scalar_prefetch = 0 : i64, scratch_operands = 1 : i64, tpu.core_type = #tpu.core_type<tc>, window_params = [{transform_indices = @transform_0, window_bounds = array<i64: 1, 8, 128>}, {transform_indices = @transform_1, window_bounds = array<i64: 1, 8, 128>}, {pipeline_mode = #tpu.pipeline_mode<synchronous>, transform_indices = @transform_2, window_bounds = array<i64: 16, 16>}, {pipeline_mode = #tpu.pipeline_mode<synchronous>, transform_indices = @transform_3, window_bounds = array<i64: 16, 8>}, {pipeline_mode = #tpu.pipeline_mode<synchronous>, transform_indices = @transform_4, window_bounds = array<i64: 16, 1>}, {pipeline_mode = #tpu.pipeline_mode<synchronous>, transform_indices = @transform_5, window_bounds = array<i64: 16, 1>}, {transform_indices = @transform_6, window_bounds = array<i64: 1, 8, 128>}, {transform_indices = @transform_7, window_bounds = array<i64: 1, 8, 128>}]} {
    %c0 = arith.constant 0 : index
    %c0_0 = arith.constant 0 : index
    %c0_1 = arith.constant 0 : index
    %0 = vector.load %arg2[%c0, %c0_0, %c0_1] : memref<1x8x128xf32, #tpu.memory_space<vmem>>, vector<1x8x128xf32>
    %1 = vector.shape_cast %0 : vector<1x8x128xf32> to vector<8x128xf32>
    %c0_i32 = arith.constant 0 : i32
    %2 = arith.cmpi eq, %arg1, %c0_i32 : i32
    %3 = arith.extui %2 : i1 to i32
    %c0_i32_2 = arith.constant 0 : i32
    %4 = arith.cmpi ne, %3, %c0_i32_2 : i32
    scf.if %4 {
      %cst_25 = arith.constant 0.000000e+00 : f32
      %42 = vector.broadcast %cst_25 : f32 to vector<8x128xf32>
      %c0_26 = arith.constant 0 : index
      %c0_27 = arith.constant 0 : index
      %43 = vector.load %arg10[%c0_26, %c0_27] : memref<8x128xf32, #tpu.memory_space<vmem>>, vector<8x128xf32>
      tpu.vector_store %arg10[%c0_26, %c0_27], %42 {strides = array<i32>} : memref<8x128xf32, #tpu.memory_space<vmem>>, vector<8x128xf32>,
    } else {
    }
    %c0_3 = arith.constant 0 : index
    %c126 = arith.constant 126 : index
    %5 = vector.load %arg10[%c0_3, %c126] : memref<8x128xf32, #tpu.memory_space<vmem>>, vector<8x2xf32>
    %c0_4 = arith.constant 0 : index
    %c0_5 = arith.constant 0 : index
    %c0_6 = arith.constant 0 : index
    %6 = vector.load %arg3[%c0_4, %c0_5, %c0_6] : memref<1x8x128xf32, #tpu.memory_space<vmem>>, vector<1x8x128xf32>
    %7 = vector.shape_cast %6 : vector<1x8x128xf32> to vector<8x128xf32>
    %c0_7 = arith.constant 0 : index
    %c0_8 = arith.constant 0 : index
    %8 = vector.load %arg4[%c0_7, %c0_8] : memref<16x16xf32, #tpu.memory_space<vmem>>, vector<16x16xf32>
    %c0_9 = arith.constant 0 : index
    %c0_10 = arith.constant 0 : index
    %9 = vector.load %arg5[%c0_9, %c0_10] : memref<16x8xf32, #tpu.memory_space<vmem>>, vector<16x8xf32>
    %c0_11 = arith.constant 0 : index
    %c0_12 = arith.constant 0 : index
    %10 = vector.load %arg6[%c0_11, %c0_12] : memref<16x1xf32, #tpu.memory_space<vmem>>, vector<16x1xf32>
    %c0_13 = arith.constant 0 : index
    %c0_14 = arith.constant 0 : index
    %11 = vector.load %arg7[%c0_13, %c0_14] : memref<16x1xf32, #tpu.memory_space<vmem>>, vector<16x1xf32>
    %12 = vector.extract_strided_slice %1 {offsets = [0, 0], sizes = [8, 126], strides = [1, 1]} : vector<8x128xf32> to vector<8x126xf32>
    %13 = tpu.concatenate %5, %12 in 1 : vector<8x2xf32>, vector<8x126xf32> -> vector<8x128xf32>
    %14 = tpu.concatenate %13, %1 in 0 : vector<8x128xf32>, vector<8x128xf32> -> vector<16x128xf32>
    %cst = arith.constant dense<0.000000e+00> : vector<16x128xf32>
    %15 = tpu.matmul %8, %14, %cst {dimension_numbers = #tpu.dot_dimension_numbers<[1], [0], [0], [1], [0, 0, 1, 1], [], []>} : vector<16x16xf32>, vector<16x128xf32>, vector<16x128xf32> -> vector<16x128xf32>
    %16 = vector.broadcast %10 : vector<16x1xf32> to vector<16x128xf32>
    %17 = arith.addf %15, %16 : vector<16x128xf32>
    %18 = vector.extract_strided_slice %17 {offsets = [0, 0], sizes = [8, 128], strides = [1, 1]} : vector<16x128xf32> to vector<8x128xf32>
    %19 = math.tanh %18 : vector<8x128xf32>
    %20 = vector.extract_strided_slice %17 {offsets = [8, 0], sizes = [8, 128], strides = [1, 1]} : vector<16x128xf32> to vector<8x128xf32>
    %21 = arith.negf %20 : vector<8x128xf32>
    %22 = math.exp %21 : vector<8x128xf32>
    %cst_15 = arith.constant 1.000000e+00 : f32
    %23 = vector.broadcast %cst_15 : f32 to vector<8x128xf32>
    %24 = arith.addf %23, %22 : vector<8x128xf32>
    %25 = arith.divf %23, %24 : vector<8x128xf32>
    %26 = arith.mulf %19, %25 : vector<8x128xf32>
    %cst_16 = arith.constant dense<0.000000e+00> : vector<16x128xf32>
    %27 = tpu.matmul %9, %26, %cst_16 {dimension_numbers = #tpu.dot_dimension_numbers<[1], [0], [0], [1], [0, 0, 1, 1], [], []>} : vector<16x8xf32>, vector<8x128xf32>, vector<16x128xf32> -> vector<16x128xf32>
    %28 = vector.broadcast %11 : vector<16x1xf32> to vector<16x128xf32>
    %29 = arith.addf %27, %28 : vector<16x128xf32>
    %30 = vector.extract_strided_slice %29 {offsets = [0, 0], sizes = [8, 128], strides = [1, 1]} : vector<16x128xf32> to vector<8x128xf32>
    %31 = arith.addf %1, %30 : vector<8x128xf32>
    %c0_17 = arith.constant 0 : index
    %c0_18 = arith.constant 0 : index
    %c0_19 = arith.constant 0 : index
    %32 = vector.load %arg8[%c0_17, %c0_18, %c0_19] : memref<1x8x128xf32, #tpu.memory_space<vmem>>, vector<1x8x128xf32>
    %33 = vector.shape_cast %32 : vector<1x8x128xf32> to vector<8x128xf32>
    %34 = vector.shape_cast %31 : vector<8x128xf32> to vector<1x8x128xf32>
    tpu.vector_store %arg8[%c0_17, %c0_18, %c0_19], %34 {strides = array<i32>} : memref<1x8x128xf32, #tpu.memory_space<vmem>>, vector<1x8x128xf32>,
    %35 = vector.extract_strided_slice %29 {offsets = [8, 0], sizes = [8, 128], strides = [1, 1]} : vector<16x128xf32> to vector<8x128xf32>
    %36 = arith.addf %7, %35 : vector<8x128xf32>
    %c0_20 = arith.constant 0 : index
    %c0_21 = arith.constant 0 : index
    %c0_22 = arith.constant 0 : index
    %37 = vector.load %arg9[%c0_20, %c0_21, %c0_22] : memref<1x8x128xf32, #tpu.memory_space<vmem>>, vector<1x8x128xf32>
    %38 = vector.shape_cast %37 : vector<1x8x128xf32> to vector<8x128xf32>
    %39 = vector.shape_cast %36 : vector<8x128xf32> to vector<1x8x128xf32>
    tpu.vector_store %arg9[%c0_20, %c0_21, %c0_22], %39 {strides = array<i32>} : memref<1x8x128xf32, #tpu.memory_space<vmem>>, vector<1x8x128xf32>,
    %40 = vector.extract_strided_slice %1 {offsets = [0, 126], sizes = [8, 2], strides = [1, 1]} : vector<8x128xf32> to vector<8x2xf32>
    %c0_23 = arith.constant 0 : index
    %c126_24 = arith.constant 126 : index
    %41 = vector.load %arg10[%c0_23, %c126_24] : memref<8x128xf32, #tpu.memory_space<vmem>>, vector<8x2xf32>
    tpu.vector_store %arg10[%c0_23, %c126_24], %40 {strides = array<i32>} : memref<8x128xf32, #tpu.memory_space<vmem>>, vector<8x2xf32>,
    return
  }
  func.func @transform_0(%arg0: i32, %arg1: i32) -> (i32, i32, i32) {
    %c0_i32 = arith.constant 0 : i32
    %c0_i32_0 = arith.constant 0 : i32
    return %arg0, %c0_i32, %arg1 : i32, i32, i32
  }
  func.func @transform_1(%arg0: i32, %arg1: i32) -> (i32, i32, i32) {
    %c0_i32 = arith.constant 0 : i32
    %c0_i32_0 = arith.constant 0 : i32
    return %arg0, %c0_i32, %arg1 : i32, i32, i32
  }
  func.func @transform_2(%arg0: i32, %arg1: i32) -> (i32, i32) {
    %c0_i32 = arith.constant 0 : i32
    %c0_i32_0 = arith.constant 0 : i32
    %c0_i32_1 = arith.constant 0 : i32
    return %c0_i32, %c0_i32_0 : i32, i32
  }
  func.func @transform_3(%arg0: i32, %arg1: i32) -> (i32, i32) {
    %c0_i32 = arith.constant 0 : i32
    %c0_i32_0 = arith.constant 0 : i32
    %c0_i32_1 = arith.constant 0 : i32
    return %c0_i32, %c0_i32_0 : i32, i32
  }
  func.func @transform_4(%arg0: i32, %arg1: i32) -> (i32, i32) {
    %c0_i32 = arith.constant 0 : i32
    %c0_i32_0 = arith.constant 0 : i32
    %c0_i32_1 = arith.constant 0 : i32
    return %c0_i32, %c0_i32_0 : i32, i32
  }
  func.func @transform_5(%arg0: i32, %arg1: i32) -> (i32, i32) {
    %c0_i32 = arith.constant 0 : i32
    %c0_i32_0 = arith.constant 0 : i32
    %c0_i32_1 = arith.constant 0 : i32
    return %c0_i32, %c0_i32_0 : i32, i32
  }
  func.func @transform_6(%arg0: i32, %arg1: i32) -> (i32, i32, i32) {
    %c0_i32 = arith.constant 0 : i32
    %c0_i32_0 = arith.constant 0 : i32
    return %arg0, %c0_i32, %arg1 : i32, i32, i32
  }
  func.func @transform_7(%arg0: i32, %arg1: i32) -> (i32, i32, i32) {
    %c0_i32 = arith.constant 0 : i32
    %c0_i32_0 = arith.constant 0 : i32
    return %arg0, %c0_i32, %arg1 : i32, i32, i32
  }
}

</mosaic_0001>

<bundles_post_ra>
// kernel: tpu_custom_call.1
= control target key start
LH: loop header
LB: loop body
LE: loop exit
PB: predicated region body
PF: predicated region fallthrough
CT: control target
= control target key end

     0   :  { %s1431_s0 = inlined_call_operand.hbm [shape: f32[2,8,512], index: 0, kind: input, shape index: {}, may-alias: {0,6}]   ;;  %s1432_s1 = inlined_call_operand.hbm [shape: f32[2,8,512], index: 1, kind: input, shape index: {}, may-alias: {1,7}]   ;;  %s1433_s2 = inlined_call_operand.vmem [shape: f32[16,16], index: 2, kind: input, shape index: {}]   ;;  %s1434_s3 = inlined_call_operand.vmem [shape: f32[16,8], index: 3, kind: input, shape index: {}]   ;;  %s1435_s4 = inlined_call_operand.vmem [shape: f32[16,1], index: 4, kind: input, shape index: {}]   ;;  %s1436_s5 = inlined_call_operand.vmem [shape: f32[16,1], index: 5, kind: input, shape index: {}]   ;;  %s1437_s6 = inlined_call_operand.hbm [shape: f32[2,8,512], index: 6, kind: output, shape index: {0}, may-alias: {0,6}]   ;;  %s1438_s7 = inlined_call_operand.hbm [shape: f32[2,8,512], index: 7, kind: output, shape index: {1}, may-alias: {1,7}]  }
   0x1   :  { %1444 = sst [smem:[#allocation20_spill]] %s1431_s0 }
   0x2   :  { %13 = vsyncpa [#allocation4], 0 }
   0x3   :  { %15 = vsyncpa [#allocation4 + $0x1], 0 }
   0x4   :  { %16 = vsyncpa [#allocation7], 0 }
   0x5   :  { %18 = vsyncpa [#allocation7 + $0x1], 0 }
   0x6   :  { %19 = vsyncpa [#allocation5], 0 }
   0x7   :  { %21 = vsyncpa [#allocation5 + $0x1], 0 }
   0x8   :  { %22 = vsyncpa [#allocation10], 0 }
   0x9   :  { %24 = vsyncpa [#allocation10 + $0x1], 0  ;;  %s1152_s24 = smov 0   ;;  %s1154_s25 = smov 0  }
   0xa   :  { %s1156_s26 = smov 0   ;;  %s1158_s27 = smov 0  }
   0xb   :  { %s1160_s28 = smov 0   ;;  %s1162_s29 = smov 0  }
   0xc   :  { %s1164_s30 = smov 0   ;;  %s1166_s8 = smov 0  }
   0xd LB: > { %1445 = sst [smem:[#allocation15_spill]] %s1075_s24  ;;  %s770_s9 = sadd.s32 4294967295, %s1103_s8   ;;  %s1103_s8 = sphi %s1166_s8, %s30_s8   ;;  %s1099_s30 = sphi %s1164_s30, %s1461_s30   ;;  %s1095_s29 = sphi %s1162_s29, %s1466_s29   ;;  %s1091_s28 = sphi %s1160_s28, %s1459_s28   ;;  %s1087_s27 = sphi %s1158_s27, %s1465_s27   ;;  %s1083_s26 = sphi %s1156_s26, %s1464_s26   ;;  %s1079_s25 = sphi %s1154_s25, %s1463_s25   ;;  %s1075_s24 = sphi %s1152_s24, %s1462_s24  }
   0xe   : > { %1446 = sst [smem:[#allocation16_spill]] %s1099_s30  ;;  %s771_s10 = sadd.s32 4294967294, %s1103_s8  }
   0xf   : > { %s39_s11 = sadd.s32 1, %s1095_s29  ;;  %s42_s12 = sadd.s32 1, %s1099_s30 }
  0x10   : > { %p40_p0 = scmp.ge.s32.totalorder %s39_s11, 4  ;;  %s51_s13 = sadd.s32 1, %s1083_s26 }
  0x11   : > { %p58_p1 = scmp.ne.s32.totalorder %s1083_s26, %s1079_s25  ;;  %p59_p2 = scmp.eq.s32.totalorder %s1103_s8, 0 }
  0x12   : > { %s1468_s11 = smov (%p40_p0, %s39_s11), 0  ;;  %s1470_s12 = smov (!%p40_p0, %s42_s12), %s1099_s30 }
  0x13   : > { %1447 = sst [smem:[#allocation17_spill]] %s1468_s11  ;;  %s47_s14 = ssub.s32 %s1095_s29, %s1468_s11 }
  0x14   : > { %p1205_p3 = por %p59_p2, %p58_p1  ;;  %p44_p4 = scmp.ge.s32.totalorder %s1470_s12, 2 }
  0x15   : > { %p64_p5 = scmp.ne.s32.totalorder %s1079_s25, %s1075_s24  ;;  %p65_p6 = scmp.eq.s32.totalorder %s770_s9, 0 }
  0x16   : > { %p202_p7 = scmp.eq.s32.totalorder %s770_s9, 7  ;;  %s1472_s12 = smov (%p44_p4, %s1470_s12), 0 }
  0x17   : > { %1449 = sst [smem:[#allocation18_spill]] %s1472_s12  ;;  %p1213_p8 = por %p65_p6, %p64_p5 }
  0x18   : > { %p1217_p9 = por %p202_p7, %p58_p1  ;;  %s46_s18 = ssub.s32 %s1099_s30, %s1472_s12 }
  0x19   : > { %p208_p10 = scmp.eq.s32.totalorder %s771_s10, 7  ;;  %s48_s19 = sor.u32 %s47_s14, %s46_s18 }
  0x1a   : > { %p49_p11 = scmp.eq.s32.totalorder %s48_s19, 0  ;;  %p840_p13 = scmp.lt.s32.totalorder %s1103_s8, 8 }
  0x1b   : > { %p1223_p12 = por %p208_p10, %p64_p5  ;;  %s1229_s21 = sand.u32 1, %s1083_s26  }
  0x1c   : > { %s1232_s22 = scalar_select %p49_p11, %s1083_s26, %s51_s13  }
  0x1d   : > { %s1452_s20 = scalar_select %p1223_p12, 1, 0 }
  0x1e   : > { %s774_s23 = sshll.u32 %s1229_s21, 3  ;;  %s775_s9 = sshll.u32 %s1099_s30, 2 }
  0x1f   : > { %1453 = sst [smem:[#allocation19_spill]] %s1452_s20  ;;  %s277_s12 = sadd.s32 %s1095_s29, %s775_s9 }
  0x20   : > { %s272_s10 = scalar_lea.vmem [#allocation3], %s774_s23  ;;  %s776_s18 = sshll.u32 %s277_s12, 7 }
  0x21   : > { %s281_s14 = sshll.u32 %s272_s10, 4  ;;  %s1454_s0 = sld [smem:[#allocation20_spill]]  ;;  %s282_s14 = int_to_ptr.vmem [resolvable:$true] %s281_s14 }
  0x22   : > { %p1244_p0 = pnand %p840_p13, %p1205_p3  ;;  %p780_p1 = scmp.ge.s32.totalorder %s1103_s8, 1 }
  0x23   : > { %p306_p2 = scmp.lt.s32.totalorder %s1103_s8, 9  ;;  %s269_s13 = scalar_lea.sflag [#allocation4], %s1229_s21 }
  0x24   : > { %p919_p4 = pneg %p1244_p0  ;;  %s930_s9 = scalar_lea.vmem %s282_s14, 128 }
  0x25   : > { %p931_p5 = scmp.ne.s32.totalorder %s282_s14, %s930_s9  ;;  %s1105_s11 = smov [#allocation3]  }
  0x26   : > { %s935_s12 = sshll.u32 %s1105_s11, 4  ;;  %s936_s12 = int_to_ptr.vmem [resolvable:$false] %s935_s12 }
  0x27   : > { %s279_s20 = scalar_lea.hbm %s1454_s0, %s776_s18  ;;  %p933_p6 = pnand %p931_p5, %p919_p4 }
  0x28   : > { %s937_s15 = scalar_lea.vmem %s936_s12, 256  ;;  %p938_p3 = scmp.lt.s32.totalorder %s282_s14, %s936_s12 }
  0x29   : > { %p934_p7 = pneg %p933_p6  ;;  %p939_p10 = scmp.lt.s32.totalorder %s937_s15, %s930_s9 }
  0x2b   : > { %p940_p11 = por %p939_p10, %p938_p3 }
  0x2d   : > { %p941_p13 = pnand %p940_p11, %p934_p7 }
  0x2f   : > { %944 = shalt.err (!%p941_p13)
}
  0x30   : > { %829 = dma.hbm_to_vmem [thread:$0]  (!%p1244_p0), %s279_s20, 128, %s282_s14, %s269_s13  }
  0x31   : > { %p1262_p5 = pnand %p780_p1, %p306_p2  ;;  %s299_s9 = scalar_lea.hbm %s1432_s1, %s776_s18 }
  0x32   : > { %s292_s12 = scalar_lea.vmem [#allocation6], %s774_s23  ;;  %s289_s0 = scalar_lea.sflag [#allocation7], %s1229_s21 }
  0x33   : > { %s301_s15 = sshll.u32 %s292_s12, 4  ;;  %s1106_s20 = smov [#allocation6]   ;;  %s302_s15 = int_to_ptr.vmem [resolvable:$true] %s301_s15 }
  0x34   : > { %s958_s30 = scalar_lea.vmem %s302_s15, 128  ;;  %s963_s14 = sshll.u32 %s1106_s20, 4  ;;  %s964_s14 = int_to_ptr.vmem [resolvable:$false] %s963_s14 }
  0x35   : > { %p959_p6 = scmp.ne.s32.totalorder %s302_s15, %s958_s30  ;;  %s965_s13 = scalar_lea.vmem %s964_s14, 256 }
  0x36   : > { %p966_p1 = scmp.lt.s32.totalorder %s302_s15, %s964_s14  ;;  %p967_p2 = scmp.lt.s32.totalorder %s965_s13, %s958_s30 }
  0x37   : > { %p961_p7 = pnand %p959_p6, %p919_p4 }
  0x38   : > { %p968_p10 = por %p967_p2, %p966_p1 }
  0x39   : > { %p962_p3 = pneg %p961_p7 }
  0x3b   : > { %p969_p11 = pnand %p968_p10, %p962_p3 }
  0x3d   : > { %972 = shalt.err (!%p969_p11)
}
  0x3e   : > { %832 = dma.hbm_to_vmem [thread:$0]  (!%p1244_p0), %s299_s9, 128, %s302_s15, %s289_s0  }
  0x3f   : > { %310 = sbr.rel (%p1262_p5) target bundleno = 673 (0x2a1), region = 44  ;;  %s1280_s21 = sand.u32 (!%p1262_p5), 1, %s1079_s25  }
  0x40   : > { %s1283_s23 = sshll.u32 (!%p1262_p5), %s1280_s21, 3  ;;  %s313_s18 = scalar_lea.sflag (!%p1262_p5), [#allocation4], %s1280_s21 }
  0x41   : > { %s316_s30 = scalar_lea.vmem (!%p1262_p5), [#allocation3], %s1283_s23 }
  0x44   : > { %1058 = dma.done.wait (%p1213_p8), %s313_s18, 128  }
  0x45   : > { %1060 = vsyncadd (%p1213_p8), %s313_s18, 4294967168  ;;  %s322_s0 = scalar_lea.sflag [#allocation7], %s1280_s21  ;;  %s325_s24 = scalar_lea.vmem [#allocation6], %s1283_s23 }
  0x46   : > { %1062 = dma.done.wait (%p1213_p8), %s322_s0, 128  }
  0x47   : > { %1064 = vsyncadd (%p1213_p8), %s322_s0, 4294967168  ;;  %v1297_v0 = vld [vmem:[%s316_s30] sm:$0xff]  ;;  %s358_s10 = scalar_lea.vmem [#allocation8], %s1283_s23  ;;  %s365_s19 = scalar_lea.vmem [#allocation9], %s1283_s23 }
  0x48   : > { %p785_p0 = scmp.ne.s32.totalorder %s1087_s27, 0 }
  0x4a   : > { %370 = sbr.rel (%p785_p0) target bundleno = 81 (0x51), region = 56 }
  0x4f   : > { %v1107_v1 = vmov 0.0  }
  0x50   : > { %371 = vst [vmem:[#allocation2] sm:$0xff] %v1107_v1 }
  0x51 PF: > { %vm588_vm0 = vcmask 1048560   ;;  %806 = vmatprep.subr.mxu0 %v1297_v0  ;;  %v374_v3 = vld [vmem:[%s1433_s2] sm:$0xff]  ;;  %vm402_vm1 = vcmask 130048   ;;  %s1108_s16 = smov 2   ;;  %v379_v4 = vld [vmem:[%s1435_s4 + $0x8] sm:$0xff]  ;;  %v1109_v5 = vmov 0  }
  0x52   : > { %807 = vmatpush3.msra.mxu0 %v1297_v0  ;;  %810 = vmatprep.mubr.msk.f32.mxu0 %vm402_vm1, %v374_v3  ;;  %v378_v6 = vld [vmem:[%s1435_s4] sm:$0xff]  ;;  %v381_v7 = vld [vmem:[%s1436_s5 + $0x8] sm:$0xff]  ;;  %vm390_vm2 = vcmask 15360   ;;  %vm502_vm3 = vcmask 64512   ;;  %s793_s14 = sshll.u32 %s1091_s28, 2  ;;  %s626_s30 = sshll.u32 %s365_s19, 4  ;;  %s1347_s30 = int_to_ptr.vmem [resolvable:$true] %s626_s30 }
  0x53   : > { %909 = vset.pattern.permute.xlu1 %v1109_v5  ;;  %910 = vset.pattern.permute.xlu0 %v1109_v5  ;;  %v375_v11 = vld [vmem:[%s1433_s2 + $0x8] sm:$0xff]  ;;  %v376_v12 = vld [vmem:[%s1434_s3] sm:$0xff]  ;;  %s607_s13 = sadd.s32 %s1087_s27, %s793_s14  ;;  %s611_s0 = sshll.u32 %s358_s10, 4  ;;  %s1357_s0 = int_to_ptr.vmem [resolvable:$true] %s611_s0 }
  0x54   : > { %399 = vperm.xlu1 %909, %v379_v4   ;;  %815 = vmatprep.mubr.msk.f32.mxu1 %vm502_vm3, %v376_v12  ;;  %v380_v13 = vld [vmem:[%s1436_s5] sm:$0xff]  ;;  %v377_v26 = vld [vmem:[%s1434_s3 + $0x8] sm:$0xff]  ;;  %s794_s18 = sshll.u32 %s607_s13, 7  ;;  %s596_s12 = scalar_lea.sflag [#allocation10], %s1280_s21 }
  0x55   : > { %v373_v28 = vld [vmem:[%s325_s24] sm:$0xff]  ;;  %s1345_s27 = scalar_lea.hbm %s1438_s7, %s794_s18  ;;  %s973_s15 = scalar_lea.vmem %s1347_s30, 128 }
  0x56   : > { %p974_p8 = scmp.ne.s32.totalorder %s1347_s30, %s973_s15  ;;  %s1110_s20 = smov [#allocation9]  }
  0x57   : > { %v372_v2 = vld [vmem:[#allocation2] sm:$0xff]  ;;  %s977_s14 = sshll.u32 %s1110_s20, 4  ;;  %s978_s14 = int_to_ptr.vmem [resolvable:$false] %s977_s14 }
  0x58   : > { %383 = vrot.lane.b32.xlu0 %v372_v2, %s1108_s16  ;;  %589 = vst.msk [vmem:[#allocation2] sm:$0xff] %vm588_vm0, %v1297_v0  ;;  %394 = vperm.xlu1 %909, %v378_v6   ;;  %p975_p4 = pnand %p974_p8, %p1217_p9  ;;  %s979_s13 = scalar_lea.vmem %s978_s14, 256 }
  0x59   : > { %p980_p5 = scmp.lt.s32.totalorder %s1347_s30, %s978_s14  ;;  %p981_p6 = scmp.lt.s32.totalorder %s979_s13, %s973_s15 }
  0x5a   : > { %p976_p13 = pneg %p975_p4 }
  0x5b   : > { %p982_p7 = por %p981_p6, %p980_p5 }
  0x5c   : > { %387 = vrot.lane.b32.xlu0 %v1297_v0, %s1108_s16  ;;  %499 = vperm.xlu1 %909, %v381_v7   ;;  %s1355_s16 = scalar_lea.hbm %s1437_s6, %s794_s18 }
  0x5d   : > { %p983_p3 = pnand %p982_p7, %p976_p13 }
  0x60   : > { %494 = vperm.xlu0 %910, %v380_v13  }
  0xca   : > { %v384_v8 = vpop.permute.xlu0 %383 }
  0xce   : > { %v388_v9 = vpop.permute.xlu0 %387 }
  0xcf   : > { %v391_v10 = vsel %vm390_vm2, %v384_v8, %v388_v9  ;;  %v400_v14 = vpop.permute.xlu1 %399 }
  0xd0   : > { %808 = vmatprep.subr.mxu0 %v391_v10 }
  0xd1   : > { %809 = vmatpush3.msra.mxu0 %v391_v10 }
  0xd2   : > { %811 = vmatmul.mubr.msk.f32.vlgmr.msra.gmra.mxu0 %vm402_vm1, %v375_v11 }
  0xd3   : > { %v395_v19 = vpop.permute.xlu1 %394 }
  0xd7   : > { %v500_v27 = vpop.permute.xlu1 %499 }
  0xdb   : > { %v495_v30 = vpop.permute.xlu0 %494 }
 0x192   : > { %v812_v15 = vpop.f32.mrf.mxu0 }
 0x193   : > { %v481_v16 = vadd.f32 %v812_v15, %v400_v14 }
 0x194   : > { %v475_v18 = vpop.f32.mrf.mxu0 }
 0x195   : > { %v788_v17 = vmul.f32 -1.442695, %v481_v16  ;;  %v476_v20 = vadd.f32 %v475_v18, %v395_v19 }
 0x197   : > { %911 = vpow2.f32 %v788_v17 }
 0x198   : > { %913 = vtanh.f32 %v476_v20 }
 0x1a4   : > { %v912_v21 = vpop.eup %911 }
 0x1a5   : > { %v488_v22 = vadd.f32 1.0, %v912_v21  ;;  %v914_v23 = vpop.eup %913 }
 0x1a7   : > { %915 = vrcp.f32 %v488_v22 }
 0x1b4   : > { %v916_v24 = vpop.eup %915 }
 0x1b5   : > { %v491_v25 = vmul.f32 %v916_v24, %v914_v23 }
 0x1b7   : > { %813 = vmatprep.subr.mxu1 %v491_v25 }
 0x1b8   : > { %814 = vmatpush3.msra.mxu1 %v491_v25 }
 0x1b9   : > { %816 = vmatmul.mubr.msk.f32.vlgmr.msra.gmra.mxu1 %vm502_vm3, %v377_v26 }
 0x279   : > { %v817_v29 = vpop.f32.mrf.mxu1 }
 0x27a   : > { %v581_v31 = vadd.f32 %v817_v29, %v500_v27 }
 0x27b   : > { %v575_v32 = vpop.f32.mrf.mxu1 }
 0x27c   : > { %v586_v33 = vadd.f32 %v581_v31, %v373_v28  ;;  %v576_v34 = vadd.f32 %v575_v32, %v495_v30 }
 0x27e   : > { %587 = vst [vmem:[%s365_s19] sm:$0xff] %v586_v33  ;;  %v584_v35 = vadd.f32 %v576_v34, %v1297_v0 }
 0x27f   : > { %986 = shalt.err (!%p983_p3)
}
 0x280   : > { %s987_s19 = scalar_lea.hbm %s1345_s27, 128  ;;  %s991_s9 = scalar_lea.hbm %s1438_s7, 1024 }
 0x281   : > { %p988_p1 = scmp.ne.s32.totalorder %s1345_s27, %s987_s19  ;;  %p992_p11 = scmp.lt.s32.totalorder %s1345_s27, %s1438_s7 }
 0x282   : > { %p993_p0 = scmp.lt.s32.totalorder %s991_s9, %s987_s19 }
 0x283   : > { %p989_p2 = pnand %p988_p1, %p1217_p9 }
 0x284   : > { %p994_p8 = por %p993_p0, %p992_p11 }
 0x285   : > { %p990_p10 = pneg %p989_p2 }
 0x287   : > { %p995_p4 = pnand %p994_p8, %p990_p10 }
 0x289   : > { %998 = shalt.err (!%p995_p4)
}
 0x28a   : > { %823 = dma.vmem_to_hbm [thread:$0]  (%p1217_p9), %s1347_s30, 128, %s1345_s27, %s596_s12   ;;  %585 = vst [vmem:[%s358_s10] sm:$0xff] %v584_v35 }
 0x28b   : > { %s591_s15 = scalar_lea.sflag [#allocation5], %s1280_s21  ;;  %s999_s20 = scalar_lea.vmem %s1357_s0, 128 }
 0x28c   : > { %p1000_p13 = scmp.ne.s32.totalorder %s1357_s0, %s999_s20  ;;  %s1111_s14 = smov [#allocation8]  }
 0x28d   : > { %s1003_s13 = sshll.u32 %s1111_s14, 4  ;;  %s1004_s13 = int_to_ptr.vmem [resolvable:$false] %s1003_s13 }
 0x28e   : > { %p1001_p5 = pnand %p1000_p13, %p1217_p9  ;;  %s1005_s19 = scalar_lea.vmem %s1004_s13, 256 }
 0x28f   : > { %p1006_p7 = scmp.lt.s32.totalorder %s1357_s0, %s1004_s13  ;;  %p1007_p3 = scmp.lt.s32.totalorder %s1005_s19, %s999_s20 }
 0x290   : > { %p1002_p6 = pneg %p1001_p5 }
 0x291   : > { %p1008_p1 = por %p1007_p3, %p1006_p7 }
 0x293   : > { %p1009_p2 = pnand %p1008_p1, %p1002_p6 }
 0x295   : > { %1012 = shalt.err (!%p1009_p2)
}
 0x296   : > { %s1013_s23 = scalar_lea.hbm %s1355_s16, 128  ;;  %s1017_s30 = scalar_lea.hbm %s1437_s6, 1024 }
 0x297   : > { %p1014_p10 = scmp.ne.s32.totalorder %s1355_s16, %s1013_s23  ;;  %p1018_p8 = scmp.lt.s32.totalorder %s1355_s16, %s1437_s6 }
 0x298   : > { %p1019_p4 = scmp.lt.s32.totalorder %s1017_s30, %s1013_s23 }
 0x299   : > { %p1015_p11 = pnand %p1014_p10, %p1217_p9 }
 0x29a   : > { %p1020_p13 = por %p1019_p4, %p1018_p8 }
 0x29b   : > { %p1016_p0 = pneg %p1015_p11 }
 0x29d   : > { %p1021_p5 = pnand %p1020_p13, %p1016_p0 }
 0x29f   : > { %1024 = shalt.err (!%p1021_p5)
}
 0x2a0   : > { %822 = dma.vmem_to_hbm [thread:$0]  (%p1217_p9), %s1357_s0, 128, %s1355_s16, %s591_s15  }
 0x2a1 PF: > { %s1457_s18 = sld [smem:[#allocation15_spill]]  ;;  %p841_p6 = scmp.ge.s32.totalorder %s1103_s8, 2 }
 0x2a3   : > { %p834_p7 = pnand %p841_p6, %p1223_p12 }
 0x2a5   : > { %p835_p3 = pneg %p834_p7 }
 0x2a7   : > { %s638_s9 = sand.u32 1, %s1457_s18  }
 0x2a8   : > { %s639_s28 = scalar_lea.sflag [#allocation5], %s638_s9 }
 0x2a9   : > { %1066 = dma.done.wait (%p835_p3), %s639_s28, 128  }
 0x2aa   : > { %1068 = vsyncadd (%p835_p3), %s639_s28, 4294967168  ;;  %s648_s24 = scalar_lea.sflag [#allocation10], %s638_s9 }
 0x2ab   : > { %1070 = dma.done.wait (%p835_p3), %s648_s24, 128  }
 0x2ac   : > { %1072 = vsyncadd (%p835_p3), %s648_s24, 4294967168  ;;  %s30_s8 = sadd.s32 1, %s1103_s8   ;;  %s1459_s28 = sld [smem:[#allocation16_spill]] }
 0x2ad   : > { %p27_p1 = scmp.ge.s32.totalorder %s30_s8, 10   ;;  %s1460_s17 = sld [smem:[#allocation17_spill]] }
 0x2ae   : > { %s1461_s30 = sld [smem:[#allocation18_spill]]  ;;  %s1462_s24 = smov %s1079_s25 }
 0x2af   : > { %s1463_s25 = smov %s1083_s26  ;;  %s1464_s26 = smov %s1232_s22 }
 0x2b0   : > { %s1465_s27 = smov %s1095_s29  ;;  %29 = sbr.rel (!%p27_p1) target bundleno = 13 (0xd), region = 123 }
 0x2b3   : > { %s1466_s29 = smov %s1460_s17 }
 0x2b5   :  { %653 = vsyncpa [#allocation4], 1 }
 0x2b6   :  { %655 = vsyncpa [#allocation4 + $0x1], 1 }
 0x2b7   :  { %656 = vsyncpa [#allocation7], 1 }
 0x2b8   :  { %658 = vsyncpa [#allocation7 + $0x1], 1 }
 0x2b9   :  { %659 = vsyncpa [#allocation5], 1 }
 0x2ba   :  { %661 = vsyncpa [#allocation5 + $0x1], 1 }
 0x2bb   :  { %662 = vsyncpa [#allocation10], 1 }
 0x2bc   :  { %664 = vsyncpa [#allocation10 + $0x1], 1 }

</bundles_post_ra>
